<compile_context>
chip_gen: v7x
topology: tpu7x:2x2x1
jax: 0.10.0
libtpu: 0.0.40
codegen_flags: <defaults>
</compile_context>

<pallas_src>
import functools

import jax
import jax.numpy as jnp
from jax.experimental import pallas as pl
from jax.experimental.pallas import tpu as pltpu


def _identity_kernel(x_ref, o_ref):
    # Whole-tile copy: the only faithful rendering of an empty forward().
    o_ref[...] = x_ref[...]


def _round_up(x: int, m: int) -> int:
    return ((x + m - 1) // m) * m


@functools.partial(jax.jit, static_argnames=("max_lane", "max_rows"))
def ma_forward(x_nchw: jax.Array, *, max_lane: int = 2048, max_rows: int = 512):
    """Pallas equivalent of MA().forward().

    The reference forward() takes no tensors and returns None; here we accept
    a dummy NCHW activation, stream it through a tiled identity Pallas kernel
    (lane-dense layout, aliased output), and return it unchanged so the
    pipeline can be validated end-to-end.
    """
    orig_shape = x_nchw.shape
    total = x_nchw.size
    flat = x_nchw.reshape(-1)

    # --- Lane-dense 2-D layout: (rows, lane), lane a multiple of 128. -------
    padded_total = _round_up(total, 128)
    lane = 128
    while lane * 2 <= max_lane and padded_total % (lane * 2) == 0:
        lane *= 2

    rows = padded_total // lane
    if rows <= max_rows:
        # Single row-block == full first dim: always a legal block shape.
        tile_rows = rows
    else:
        tile_rows = max_rows  # multiple of 8 -> legal sublane tiling
        rows = _round_up(rows, tile_rows)
    padded_total = rows * lane

    # Only a tiny contiguous tail pad (zero for the example shape).
    if padded_total != total:
        flat = jnp.pad(flat, (0, padded_total - total))
    x2d = flat.reshape(rows, lane)

    grid = (rows // tile_rows,)

    out2d = pl.pallas_call(
        _identity_kernel,
        out_shape=jax.ShapeDtypeStruct((rows, lane), x2d.dtype),
        grid=grid,
        in_specs=[pl.BlockSpec((tile_rows, lane), lambda i: (i, 0))],
        out_specs=pl.BlockSpec((tile_rows, lane), lambda i: (i, 0)),
        # Pure identity: let the output alias the (wrapper-internal) input
        # buffer -> no second full-size HBM allocation / write stream.
        input_output_aliases={0: 0},
        compiler_params=pltpu.CompilerParams(
            dimension_semantics=("parallel",),
            vmem_limit_bytes=48 * 1024 * 1024,
        ),
    )(x2d)

    out_flat = out2d.reshape(-1)
    if padded_total != total:
        out_flat = out_flat[:total]  # contiguous tail slice only
    return out_flat.reshape(orig_shape)


if __name__ == "__main__":
    key = jax.random.PRNGKey(0)
    # Small NCHW activation: batch=2, channels=4, spatial=16x16.
    x = jax.random.normal(key, (2, 4, 16, 16), dtype=jnp.float32)

    y = ma_forward(x)
    y = jax.block_until_ready(y)

    # Identity semantics check (the only semantics the empty forward defines).
    assert y.shape == x.shape
    assert jnp.allclose(y, x)

    print("KERNEL_OK")
</pallas_src>

<mosaic_0001>
module attributes {stable_mosaic.version = 11 : i64} {
  func.func @_identity_kernel(%arg0: i32, %arg1: memref<1x2048xf32, #tpu.memory_space<vmem>>, %arg2: memref<1x2048xf32, #tpu.memory_space<vmem>>) attributes {dimension_semantics = [#tpu.dimension_semantics<parallel>], iteration_bounds = array<i64: 1>, scalar_prefetch = 0 : i64, scratch_operands = 0 : i64, tpu.core_type = #tpu.core_type<tc>, window_params = [{transform_indices = @transform_0, window_bounds = array<i64: 1, 2048>}, {transform_indices = @transform_1, window_bounds = array<i64: 1, 2048>}]} {
    %c0 = arith.constant 0 : index
    %c0_0 = arith.constant 0 : index
    %0 = vector.load %arg1[%c0, %c0_0] : memref<1x2048xf32, #tpu.memory_space<vmem>>, vector<1x2048xf32>
    %c0_1 = arith.constant 0 : index
    %c0_2 = arith.constant 0 : index
    %1 = vector.load %arg2[%c0_1, %c0_2] : memref<1x2048xf32, #tpu.memory_space<vmem>>, vector<1x2048xf32>
    tpu.vector_store %arg2[%c0_1, %c0_2], %0 {strides = array<i32>} : memref<1x2048xf32, #tpu.memory_space<vmem>>, vector<1x2048xf32>,
    return
  }
  func.func @transform_0(%arg0: i32) -> (i32, i32) {
    %c0_i32 = arith.constant 0 : i32
    %c0_i32_0 = arith.constant 0 : i32
    return %arg0, %c0_i32 : i32, i32
  }
  func.func @transform_1(%arg0: i32) -> (i32, i32) {
    %c0_i32 = arith.constant 0 : i32
    %c0_i32_0 = arith.constant 0 : i32
    return %arg0, %c0_i32 : i32, i32
  }
}

</mosaic_0001>

<bundles_post_ra>
// kernel: ma_forward.1
= control target key start
LH: loop header
LB: loop body
LE: loop exit
PB: predicated region body
PF: predicated region fallthrough
CT: control target
= control target key end

     0   :  { %s38_s0 = inlined_call_operand.vmem [shape: f32[1,2048], index: 0, kind: input, shape index: {}, may-alias: {0,1}]   ;;  %s39_s1 = inlined_call_operand.vmem [shape: f32[1,2048], index: 1, kind: output, shape index: {}, may-alias: {0,1}]  }
   0x1   :  { %v8_v0 = vld [vmem:[%s38_s0] sm:$0xff]  ;;  %v9_v1 = vld [vmem:[%s38_s0 + $0x8] sm:$0xff] }
   0x2   :  { %10 = vst [vmem:[%s39_s1] sm:$0xff] %v8_v0  ;;  %11 = vst [vmem:[%s39_s1 + $0x8] sm:$0xff] %v9_v1 }

</bundles_post_ra>
